<compile_context>
chip_gen: v6e
topology: v6e:2x2x1
jax: 0.10.0
libtpu: 0.0.40
codegen_flags: <defaults>
</compile_context>

<pallas_src>
import jax
import jax.numpy as jnp
from jax import lax
from jax.experimental import pallas as pl
from jax.experimental.pallas import tpu as pltpu

INPUT_SIZE = 5
HIDDEN = 8
NUM_CLASSES = 1


def _mlp_kernel(x_ref, w_ref, b_ref, o_ref):
    # x_ref: [bt, 5]    natural row-major batch block (batch on sublanes here)
    # w_ref: [4, 8, 8]  packed weights (bf16 or f32):
    #                   [0, :, :5] = W1, [1] = W2, [2] = W3, [3, :, 0] = W4[0, :]
    # b_ref: [4, 8, 1]  packed f32 biases ([3, 0, 0] = b4)
    # o_ref: [1, bt]    lane-dense output block
    w = w_ref[...]          # hoisted: whole packed param set is ~2 vregs
    b = b_ref[...]
    cdt = w.dtype           # MXU input dtype (bf16 by default, f32 if requested)

    # fc1 + relu1: fold the input transpose into the matmul by contracting the
    # last (feature) axes of W1 [8,5] and x [bt,5]  ->  [8, bt] (batch on lanes).
    x = x_ref[...].astype(cdt)
    h = lax.dot_general(
        w[0, :, :INPUT_SIZE], x,
        dimension_numbers=(((1,), (1,)), ((), ())),
        preferred_element_type=jnp.float32)
    h = jnp.maximum(h + b[0], 0.0)

    # fc2/relu2, fc3/relu3: [8,8] @ [8,bt] on the MXU, f32 accumulation.
    for i in (1, 2):                                   # static unroll
        h = jnp.dot(w[i], h.astype(cdt), preferred_element_type=jnp.float32)
        h = jnp.maximum(h + b[i], 0.0)

    # fc4 (out_features == 1): VPU broadcast-MAC + sublane reduction -> [1, bt].
    w4 = w[3, :, 0:1].astype(jnp.float32)              # [8, 1]
    y = jnp.sum(w4 * h, axis=0, keepdims=True) + b[3, 0:1, :]

    # torch.clamp(out, max=100)
    o_ref[...] = jnp.minimum(y, 100.0).astype(o_ref.dtype)


def _pack_params(params, use_bf16=True):
    """Pack the 4 layers into one weight slab [4,8,8] and one bias slab [4,8,1]."""
    wdt = jnp.bfloat16 if use_bf16 else jnp.float32
    wp = jnp.zeros((4, HIDDEN, HIDDEN), wdt)
    wp = wp.at[0, :, :INPUT_SIZE].set(params["w1"].astype(wdt))   # [8, 5]
    wp = wp.at[1].set(params["w2"].astype(wdt))                   # [8, 8]
    wp = wp.at[2].set(params["w3"].astype(wdt))                   # [8, 8]
    wp = wp.at[3, :, 0:1].set(params["w4"].T.astype(wdt))         # [8, 1] column
    bp = jnp.zeros((4, HIDDEN, 1), jnp.float32)
    bp = bp.at[0, :, 0].set(params["b1"])
    bp = bp.at[1, :, 0].set(params["b2"])
    bp = bp.at[2, :, 0].set(params["b3"])
    bp = bp.at[3, 0, 0].set(params["b4"][0])
    return wp, bp


def charge_neural_net_forward(x, params, *, block_b=16384, target_grid_steps=8,
                              use_bf16=True):
    """x: [B, 5] float32, params in PyTorch layout (w: [out,in], b: [out]).

    Returns [B, 1] float32 matching ChargeNeuralNet.forward.
    """
    B, F = x.shape
    assert F == INPUT_SIZE
    assert params["w4"].shape[0] == NUM_CLASSES == 1

    wp, bp = _pack_params(params, use_bf16)

    # Batch-tile size: a multiple of 128 lanes, capped so (a) VMEM stays small
    # ([bt,5] f32 pads to 128 lanes -> 512*bt bytes/buffer) and (b) the grid
    # has ~target_grid_steps steps when B is large enough, so both v7x
    # TensorCores get work and the DMA pipeline overlaps compute.
    bt = min(block_b, max(128, pl.cdiv(B, target_grid_steps * 128) * 128))
    grid_b = pl.cdiv(B, bt)
    b_pad = grid_b * bt

    # Fast path: zero-copy input when B divides the tile.  Ragged B pays only
    # a cheap row zero-pad (20 B/row, no transpose, no feature padding).
    x_in = x if b_pad == B else jnp.pad(x, ((0, b_pad - B), (0, 0)))

    out = pl.pallas_call(
        _mlp_kernel,
        out_shape=jax.ShapeDtypeStruct((1, b_pad), jnp.float32),
        grid=(grid_b,),
        in_specs=[
            pl.BlockSpec((bt, INPUT_SIZE), lambda i: (i, 0)),        # streamed x blocks
            pl.BlockSpec((4, HIDDEN, HIDDEN), lambda i: (0, 0, 0)),  # resident weights
            pl.BlockSpec((4, HIDDEN, 1), lambda i: (0, 0, 0)),       # resident biases
        ],
        out_specs=pl.BlockSpec((1, bt), lambda i: (0, i)),           # lane-dense output
        compiler_params=pltpu.CompilerParams(
            dimension_semantics=("parallel",),          # megacore split on v7x
            vmem_limit_bytes=32 * 1024 * 1024),         # safe on v5e/v6e/v7x
    )(x_in, wp, bp)

    # Drop padded columns; present the PyTorch output shape [B, 1].
    return out[0, :B].reshape(B, 1)


def init_params(key, input_size=INPUT_SIZE, num_classes=NUM_CLASSES):
    """nn.Linear-style init: U(-1/sqrt(fan_in), 1/sqrt(fan_in)); PyTorch layout."""
    dims = [(8, input_size), (8, 8), (8, 8), (num_classes, 8)]  # (out, in)
    params = {}
    for idx, (fan_out, fan_in) in enumerate(dims, start=1):
        key, kw, kb = jax.random.split(key, 3)
        bound = 1.0 / jnp.sqrt(jnp.float32(fan_in))
        params[f"w{idx}"] = jax.random.uniform(
            kw, (fan_out, fan_in), jnp.float32, minval=-bound, maxval=bound)
        params[f"b{idx}"] = jax.random.uniform(
            kb, (fan_out,), jnp.float32, minval=-bound, maxval=bound)
    return params


def _ref_forward(x, p):
    """Exact f32 reference of the PyTorch forward."""
    h = jnp.maximum(x @ p["w1"].T + p["b1"], 0.0)
    h = jnp.maximum(h @ p["w2"].T + p["b2"], 0.0)
    h = jnp.maximum(h @ p["w3"].T + p["b3"], 0.0)
    h = h @ p["w4"].T + p["b4"]
    return jnp.minimum(h, 100.0)


def _ref_forward_bf16(x, p):
    """Reference mirroring the kernel's bf16-input / f32-accumulate numerics."""
    c = lambda a: a.astype(jnp.bfloat16)
    f32 = jnp.float32
    h = jnp.maximum(jnp.dot(c(x), c(p["w1"]).T, preferred_element_type=f32) + p["b1"], 0.0)
    h = jnp.maximum(jnp.dot(c(h), c(p["w2"]).T, preferred_element_type=f32) + p["b2"], 0.0)
    h = jnp.maximum(jnp.dot(c(h), c(p["w3"]).T, preferred_element_type=f32) + p["b3"], 0.0)
    h = h @ c(p["w4"]).astype(f32).T + p["b4"]
    return jnp.minimum(h, 100.0)


if __name__ == "__main__":
    key = jax.random.PRNGKey(0)
    kx1, kx2, kx3, kp = jax.random.split(key, 4)
    params = init_params(kp)

    # Case 1: tiny batch (single padded tile), bf16 MXU path.
    x1 = jax.random.normal(kx1, (8, INPUT_SIZE), dtype=jnp.float32)
    out1 = charge_neural_net_forward(x1, params)
    jax.block_until_ready(out1)
    assert out1.shape == (8, NUM_CLASSES)
    assert jnp.allclose(out1, _ref_forward_bf16(x1, params), atol=5e-3, rtol=5e-3)
    assert jnp.allclose(out1, _ref_forward(x1, params), atol=5e-2, rtol=5e-2)

    # Case 2: tile-aligned batch (zero-copy input path, grid = (2,)), bf16 path.
    x2 = jax.random.normal(kx2, (256, INPUT_SIZE), dtype=jnp.float32)
    out2 = charge_neural_net_forward(x2, params)
    jax.block_until_ready(out2)
    assert out2.shape == (256, NUM_CLASSES)
    assert jnp.allclose(out2, _ref_forward_bf16(x2, params), atol=5e-3, rtol=5e-3)
    assert jnp.allclose(out2, _ref_forward(x2, params), atol=5e-2, rtol=5e-2)

    # Case 3: ragged batch (row-padded, grid = (3,)) with f32 weights — exact path.
    x3 = jax.random.normal(kx3, (300, INPUT_SIZE), dtype=jnp.float32)
    out3 = charge_neural_net_forward(x3, params, use_bf16=False)
    jax.block_until_ready(out3)
    assert out3.shape == (300, NUM_CLASSES)
    assert jnp.allclose(out3, _ref_forward(x3, params), atol=1e-4, rtol=1e-4)

    print("KERNEL_OK")
</pallas_src>

<mosaic_0001>
module attributes {stable_mosaic.version = 11 : i64} {
  func.func @_mlp_kernel(%arg0: i32, %arg1: memref<128x5xf32, #tpu.memory_space<vmem>>, %arg2: memref<4x8x8xbf16, #tpu.memory_space<vmem>>, %arg3: memref<4x8x1xf32, #tpu.memory_space<vmem>>, %arg4: memref<1x128xf32, #tpu.memory_space<vmem>>) attributes {dimension_semantics = [#tpu.dimension_semantics<parallel>], iteration_bounds = array<i64: 1>, scalar_prefetch = 0 : i64, scratch_operands = 0 : i64, tpu.core_type = #tpu.core_type<tc>, window_params = [{transform_indices = @transform_0, window_bounds = array<i64: 128, 5>}, {pipeline_mode = #tpu.pipeline_mode<synchronous>, transform_indices = @transform_1, window_bounds = array<i64: 4, 8, 8>}, {pipeline_mode = #tpu.pipeline_mode<synchronous>, transform_indices = @transform_2, window_bounds = array<i64: 4, 8, 1>}, {transform_indices = @transform_3, window_bounds = array<i64: 1, 128>}]} {
    %c0 = arith.constant 0 : index
    %c0_0 = arith.constant 0 : index
    %c0_1 = arith.constant 0 : index
    %0 = vector.load %arg2[%c0, %c0_0, %c0_1] : memref<4x8x8xbf16, #tpu.memory_space<vmem>>, vector<4x8x8xbf16>
    %c0_2 = arith.constant 0 : index
    %c0_3 = arith.constant 0 : index
    %c0_4 = arith.constant 0 : index
    %1 = vector.load %arg3[%c0_2, %c0_3, %c0_4] : memref<4x8x1xf32, #tpu.memory_space<vmem>>, vector<4x8x1xf32>
    %c0_5 = arith.constant 0 : index
    %c0_6 = arith.constant 0 : index
    %2 = vector.load %arg1[%c0_5, %c0_6] : memref<128x5xf32, #tpu.memory_space<vmem>>, vector<128x5xf32>
    %3 = arith.truncf %2 : vector<128x5xf32> to vector<128x5xbf16>
    %4 = vector.extract_strided_slice %0 {offsets = [0, 0, 0], sizes = [1, 8, 5], strides = [1, 1, 1]} : vector<4x8x8xbf16> to vector<1x8x5xbf16>
    %5 = vector.shape_cast %4 : vector<1x8x5xbf16> to vector<8x5xbf16>
    %cst = arith.constant dense<0.000000e+00> : vector<8x128xf32>
    %6 = tpu.matmul %5, %3, %cst {dimension_numbers = #tpu.dot_dimension_numbers<[1], [1], [0], [0], [0, 0, 1, 0], [], []>} : vector<8x5xbf16>, vector<128x5xbf16>, vector<8x128xf32> -> vector<8x128xf32>
    %7 = vector.extract_strided_slice %1 {offsets = [0, 0, 0], sizes = [1, 8, 1], strides = [1, 1, 1]} : vector<4x8x1xf32> to vector<1x8x1xf32>
    %8 = vector.shape_cast %7 : vector<1x8x1xf32> to vector<8x1xf32>
    %9 = vector.broadcast %8 : vector<8x1xf32> to vector<8x128xf32>
    %10 = arith.addf %6, %9 : vector<8x128xf32>
    %cst_7 = arith.constant 0.000000e+00 : f32
    %11 = vector.broadcast %cst_7 : f32 to vector<8x128xf32>
    %12 = arith.maximumf %10, %11 : vector<8x128xf32>
    %13 = vector.extract_strided_slice %0 {offsets = [1, 0, 0], sizes = [1, 8, 8], strides = [1, 1, 1]} : vector<4x8x8xbf16> to vector<1x8x8xbf16>
    %14 = vector.shape_cast %13 : vector<1x8x8xbf16> to vector<8x8xbf16>
    %15 = arith.truncf %12 : vector<8x128xf32> to vector<8x128xbf16>
    %cst_8 = arith.constant dense<0.000000e+00> : vector<8x128xf32>
    %16 = tpu.matmul %14, %15, %cst_8 {dimension_numbers = #tpu.dot_dimension_numbers<[1], [0], [0], [1], [0, 0, 1, 1], [], []>} : vector<8x8xbf16>, vector<8x128xbf16>, vector<8x128xf32> -> vector<8x128xf32>
    %17 = vector.extract_strided_slice %1 {offsets = [1, 0, 0], sizes = [1, 8, 1], strides = [1, 1, 1]} : vector<4x8x1xf32> to vector<1x8x1xf32>
    %18 = vector.shape_cast %17 : vector<1x8x1xf32> to vector<8x1xf32>
    %19 = vector.broadcast %18 : vector<8x1xf32> to vector<8x128xf32>
    %20 = arith.addf %16, %19 : vector<8x128xf32>
    %cst_9 = arith.constant 0.000000e+00 : f32
    %21 = vector.broadcast %cst_9 : f32 to vector<8x128xf32>
    %22 = arith.maximumf %20, %21 : vector<8x128xf32>
    %23 = vector.extract_strided_slice %0 {offsets = [2, 0, 0], sizes = [1, 8, 8], strides = [1, 1, 1]} : vector<4x8x8xbf16> to vector<1x8x8xbf16>
    %24 = vector.shape_cast %23 : vector<1x8x8xbf16> to vector<8x8xbf16>
    %25 = arith.truncf %22 : vector<8x128xf32> to vector<8x128xbf16>
    %cst_10 = arith.constant dense<0.000000e+00> : vector<8x128xf32>
    %26 = tpu.matmul %24, %25, %cst_10 {dimension_numbers = #tpu.dot_dimension_numbers<[1], [0], [0], [1], [0, 0, 1, 1], [], []>} : vector<8x8xbf16>, vector<8x128xbf16>, vector<8x128xf32> -> vector<8x128xf32>
    %27 = vector.extract_strided_slice %1 {offsets = [2, 0, 0], sizes = [1, 8, 1], strides = [1, 1, 1]} : vector<4x8x1xf32> to vector<1x8x1xf32>
    %28 = vector.shape_cast %27 : vector<1x8x1xf32> to vector<8x1xf32>
    %29 = vector.broadcast %28 : vector<8x1xf32> to vector<8x128xf32>
    %30 = arith.addf %26, %29 : vector<8x128xf32>
    %cst_11 = arith.constant 0.000000e+00 : f32
    %31 = vector.broadcast %cst_11 : f32 to vector<8x128xf32>
    %32 = arith.maximumf %30, %31 : vector<8x128xf32>
    %33 = vector.extract_strided_slice %0 {offsets = [3, 0, 0], sizes = [1, 8, 1], strides = [1, 1, 1]} : vector<4x8x8xbf16> to vector<1x8x1xbf16>
    %34 = vector.shape_cast %33 : vector<1x8x1xbf16> to vector<8x1xbf16>
    %35 = arith.extf %34 : vector<8x1xbf16> to vector<8x1xf32>
    %36 = vector.broadcast %35 : vector<8x1xf32> to vector<8x128xf32>
    %37 = arith.mulf %36, %32 : vector<8x128xf32>
    %cst_12 = arith.constant dense<0.000000e+00> : vector<128xf32>
    %38 = vector.multi_reduction <add>, %37, %cst_12 [0] : vector<8x128xf32> to vector<128xf32>
    %39 = vector.shape_cast %38 : vector<128xf32> to vector<1x128xf32>
    %40 = vector.extract_strided_slice %1 {offsets = [3, 0, 0], sizes = [1, 1, 1], strides = [1, 1, 1]} : vector<4x8x1xf32> to vector<1x1x1xf32>
    %41 = vector.shape_cast %40 : vector<1x1x1xf32> to vector<1x1xf32>
    %42 = vector.broadcast %41 : vector<1x1xf32> to vector<1x128xf32>
    %43 = arith.addf %39, %42 : vector<1x128xf32>
    %cst_13 = arith.constant 1.000000e+02 : f32
    %44 = vector.broadcast %cst_13 : f32 to vector<1x128xf32>
    %45 = arith.minimumf %43, %44 : vector<1x128xf32>
    %c0_14 = arith.constant 0 : index
    %c0_15 = arith.constant 0 : index
    %46 = vector.load %arg4[%c0_14, %c0_15] : memref<1x128xf32, #tpu.memory_space<vmem>>, vector<1x128xf32>
    tpu.vector_store %arg4[%c0_14, %c0_15], %45 {strides = array<i32>} : memref<1x128xf32, #tpu.memory_space<vmem>>, vector<1x128xf32>,
    return
  }
  func.func @transform_0(%arg0: i32) -> (i32, i32) {
    %c0_i32 = arith.constant 0 : i32
    %c0_i32_0 = arith.constant 0 : i32
    return %arg0, %c0_i32 : i32, i32
  }
  func.func @transform_1(%arg0: i32) -> (i32, i32, i32) {
    %c0_i32 = arith.constant 0 : i32
    %c0_i32_0 = arith.constant 0 : i32
    %c0_i32_1 = arith.constant 0 : i32
    %c0_i32_2 = arith.constant 0 : i32
    return %c0_i32, %c0_i32_0, %c0_i32_1 : i32, i32, i32
  }
  func.func @transform_2(%arg0: i32) -> (i32, i32, i32) {
    %c0_i32 = arith.constant 0 : i32
    %c0_i32_0 = arith.constant 0 : i32
    %c0_i32_1 = arith.constant 0 : i32
    %c0_i32_2 = arith.constant 0 : i32
    return %c0_i32, %c0_i32_0, %c0_i32_1 : i32, i32, i32
  }
  func.func @transform_3(%arg0: i32) -> (i32, i32) {
    %c0_i32 = arith.constant 0 : i32
    %c0_i32_0 = arith.constant 0 : i32
    return %c0_i32, %arg0 : i32, i32
  }
}

</mosaic_0001>

<bundles_post_ra>
// kernel: tpu_custom_call.1
= control target key start
LH: loop header
LB: loop body
LE: loop exit
PB: predicated region body
PF: predicated region fallthrough
CT: control target
= control target key end

     0   :  { %vm53_vm0 = vcmask 39936   ;;  %v341_v2 = vmov 0.0   ;;  %vm342_vm1 = vmmov 0   ;;  %v343_v6 = vmov 0   ;;  %s469_s0 = inlined_call_operand.vmem [shape: f32[128,5], index: 0, kind: input, shape index: {}]   ;;  %s470_s1 = inlined_call_operand.vmem [shape: bf16[4,8,8], index: 1, kind: input, shape index: {}]   ;;  %s471_s2 = inlined_call_operand.vmem [shape: f32[4,8,1], index: 2, kind: input, shape index: {}]   ;;  %s472_s3 = inlined_call_operand.hbm [shape: f32[1,128], index: 3, kind: output, shape index: {}]  }
   0x1   :  { %v38_v0 = vld [vmem:[%s469_s0 + $0x70] sm:$0xff]  ;;  %v39_v1 = vld [vmem:[%s469_s0 + $0x78] sm:$0xff]  ;;  %281 = vmatprep.subr.bf16.mxu0 %v341_v2  ;;  %297 = vmatprep.mubr.msk.bf16.mxu0 %vm342_vm1, %v341_v2  ;;  %v36_v4 = vld [vmem:[%s469_s0 + $0x60] sm:$0xff] }
   0x2   :  { %v47_v3 = vpack.c.bf16 %v39_v1, %v38_v0  ;;  %v37_v5 = vld [vmem:[%s469_s0 + $0x68] sm:$0xff]  ;;  %317 = vset.pattern.permute.xlu0 %v343_v6  ;;  %301 = vmatprep.subr.bf16.mxu1 %v341_v2  ;;  %v20_v9 = vld [vmem:[%s471_s2] sm:$0xff] }
   0x3   :  { %303 = vmatprep.mubr.msk.bf16.mxu1 %vm342_vm1, %v341_v2  ;;  %318 = vset.pattern.permute.xlu1 %v343_v6  ;;  %v46_v8 = vpack.c.bf16 %v37_v5, %v36_v4 }
   0x4   :  { %v79_v7 = vsel %vm53_vm0, %v47_v3, 0  ;;  %50 = vperm.xlu0 %317, %v20_v9  }
   0x5   :  { %282 = vmatpush3.bf16.xpose.msra.mxu0 %v79_v7 }
   0x6   :  { %283 = vmatprep.subr.bf16.mxu0 %v341_v2 }
   0x7   :  { %8 = vsyncpa [#allocation3], 0  ;;  %v21_v10 = vld [vmem:[%s471_s2 + $0x8] sm:$0xff]  ;;  %v76_v11 = vsel %vm53_vm0, %v46_v8, 0  ;;  %v34_v12 = vld [vmem:[%s469_s0 + $0x50] sm:$0xff]  ;;  %vm132_vm2 = vcmask 1043456  }
   0x8   :  { %v35_v13 = vld [vmem:[%s469_s0 + $0x58] sm:$0xff]  ;;  %125 = vperm.xlu0 %317, %v21_v10   ;;  %v32_v17 = vld [vmem:[%s469_s0 + $0x40] sm:$0xff]  ;;  %v33_v18 = vld [vmem:[%s469_s0 + $0x48] sm:$0xff]  ;;  %vm128_vm3 = vcmask 64512   ;;  %s344_s4 = smov [#allocation2]  }
   0x9   :  { %v23_v14 = vld [vmem:[%s471_s2 + $0x18] sm:$0xff]  ;;  %v45_v15 = vpack.c.bf16 %v35_v13, %v34_v12  ;;  %v44_v19 = vpack.c.bf16 %v33_v18, %v32_v17  ;;  %v30_v21 = vld [vmem:[%s469_s0 + $0x30] sm:$0xff]  ;;  %v28_v25 = vld [vmem:[%s469_s0 + $0x20] sm:$0xff] }
   0xa   :  { %v31_v22 = vld [vmem:[%s469_s0 + $0x38] sm:$0xff]  ;;  %v29_v26 = vld [vmem:[%s469_s0 + $0x28] sm:$0xff]  ;;  %v26_v29 = vld [vmem:[%s469_s0 + $0x10] sm:$0xff] }
   0xb   :  { %v73_v16 = vsel %vm53_vm0, %v45_v15, 0  ;;  %v70_v20 = vsel %vm53_vm0, %v44_v19, 0  ;;  %v43_v23 = vpack.c.bf16 %v31_v22, %v30_v21  ;;  %v42_v27 = vpack.c.bf16 %v29_v26, %v28_v25  ;;  %v27_v30 = vld [vmem:[%s469_s0 + $0x18] sm:$0xff]  ;;  %v24_v33 = vld [vmem:[%s469_s0] sm:$0xff]  ;;  %v25_v34 = vld [vmem:[%s469_s0 + $0x8] sm:$0xff] }
   0xc   :  { %245 = vperm.xlu0 %317, %v23_v14   ;;  %v41_v31 = vpack.c.bf16 %v27_v30, %v26_v29  ;;  %v40_v35 = vpack.c.bf16 %v25_v34, %v24_v33  ;;  %v16_v37 = vld [vmem:[%s470_s1] sm:$0xf]  ;;  %v17_v47 = vld [vmem:[%s470_s1 + $0x4] sm:$0xf]  ;;  %v22_v48 = vld [vmem:[%s471_s2 + $0x10] sm:$0xff] }
   0xd   :  { %284 = vmatpush3.bf16.xpose.msra.mxu0 %v76_v11  ;;  %v67_v24 = vsel %vm53_vm0, %v43_v23, 0  ;;  %v64_v28 = vsel %vm53_vm0, %v42_v27, 0  ;;  %v19_v49 = vld [vmem:[%s470_s1 + $0xc] sm:$0xf]  ;;  %180 = vperm.xlu1 %318, %v22_v48   ;;  %v18_v60 = vld [vmem:[%s470_s1 + $0x8] sm:$0xf] }
   0xe   :  { %285 = vmatprep.subr.bf16.mxu0 %v341_v2  ;;  %v61_v32 = vsel %vm53_vm0, %v41_v31, 0  ;;  %v58_v36 = vsel %vm53_vm0, %v40_v35, 0  ;;  %v230_v50 = vunpack.c.l.bf16 %v19_v49  ;;  %s257_s1 = sshll.u32 %s344_s4, 4  ;;  %s258_s1 = int_to_ptr.vmem [resolvable:$true] %s257_s1 }
   0xf   :  { %s319_s5 = scalar_lea.vmem %s258_s1, 16  ;;  %s323_s6 = scalar_lea.vmem %s258_s1, 32 }
  0x10   :  { %p320_p0 = scmp.ne.s32.totalorder %s258_s1, %s319_s5  ;;  %p324_p1 = scmp.lt.s32.totalorder %s258_s1, %s258_s1 }
  0x11   :  { %233 = vperm.xlu1 %318, %v230_v50   ;;  %p325_p2 = scmp.lt.s32.totalorder %s323_s6, %s319_s5 }
  0x13   :  { %p326_p3 = por %p325_p2, %p324_p1 }
  0x15   :  { %286 = vmatpush3.bf16.xpose.msra.mxu0 %v73_v16  ;;  %p327_p4 = pnand %p326_p3, %p320_p0 }
  0x16   :  { %287 = vmatprep.subr.bf16.mxu0 %v341_v2 }
  0x1d   :  { %288 = vmatpush3.bf16.xpose.msra.mxu0 %v70_v20 }
  0x1e   :  { %289 = vmatprep.subr.bf16.mxu0 %v341_v2 }
  0x25   :  { %290 = vmatpush3.bf16.xpose.msra.mxu0 %v67_v24 }
  0x26   :  { %291 = vmatprep.subr.bf16.mxu0 %v341_v2 }
  0x2d   :  { %292 = vmatpush3.bf16.xpose.msra.mxu0 %v64_v28 }
  0x2e   :  { %293 = vmatprep.subr.bf16.mxu0 %v341_v2 }
  0x35   :  { %294 = vmatpush3.bf16.xpose.msra.mxu0 %v61_v32 }
  0x36   :  { %295 = vmatprep.subr.bf16.mxu0 %v341_v2 }
  0x3d   :  { %296 = vmatpush3.bf16.xpose.msra.mxu0 %v58_v36 }
  0x44   :  { %298 = vmatmul.mubr.msk.bf16.vlgmr.msra.gmra.mxu0 %vm53_vm0, %v16_v37 }
  0x7f   :  { %v51_v38 = vpop.permute.xlu0 %50 }
  0x83   :  { %v126_v51 = vpop.permute.xlu0 %125 }
  0x87   :  { %v246_v12 = vpop.permute.xlu0 %245 }
  0x88   :  { %v181_v61 = vpop.permute.xlu1 %180 }
 0x104   :  { %v115_v39 = vpop.f32.mrf.mxu0 }
 0x105   :  { %v116_v40 = vadd.f32 %v115_v39, %v51_v38 }
 0x106   :  { %v299_v41 = vpop.f32.mrf.mxu0 }
 0x107   :  { %v121_v42 = vmax.f32 %v116_v40, 0.0 }
 0x108   :  { %v118_v43 = vpop.f32.mrf.mxu0 }
 0x109   :  { %v122_v44 = vpack.c.bf16 %v121_v42, %v121_v42 }
 0x10a   :  { %v300_v45 = vpop.f32.mrf.mxu0 }
 0x10b   :  { %v134_v46 = vsel %vm132_vm2, %v122_v44, 0 }
 0x10c   :  { %302 = vmatpush3.bf16.msra.mxu1 %v134_v46 }
 0x10d   :  { %307 = vmatprep.subr.bf16.mxu1 %v341_v2 }
 0x10f   :  { %304 = vmatmul.mubr.msk.bf16.vlgmr.msra.gmra.mxu1 %vm128_vm3, %v17_v47 }
 0x110   :  { %309 = vmatprep.mubr.msk.bf16.mxu1 %vm342_vm1, %v341_v2  ;;  %v234_v2 = vpop.permute.xlu1 %233 }
 0x1cf   :  { %v170_v52 = vpop.f32.mrf.mxu1 }
 0x1d0   :  { %v171_v53 = vadd.f32 %v170_v52, %v126_v51 }
 0x1d1   :  { %v305_v54 = vpop.f32.mrf.mxu1 }
 0x1d2   :  { %v176_v55 = vmax.f32 %v171_v53, 0.0 }
 0x1d3   :  { %v173_v56 = vpop.f32.mrf.mxu1 }
 0x1d4   :  { %v177_v57 = vpack.c.bf16 %v176_v55, %v176_v55 }
 0x1d5   :  { %v306_v58 = vpop.f32.mrf.mxu1 }
 0x1d6   :  { %v187_v59 = vsel %vm132_vm2, %v177_v57, 0 }
 0x1d7   :  { %308 = vmatpush3.bf16.msra.mxu1 %v187_v59 }
 0x1da   :  { %310 = vmatmul.mubr.msk.bf16.vlgmr.msra.gmra.mxu1 %vm128_vm3, %v18_v60 }
 0x29a   :  { %v223_v62 = vpop.f32.mrf.mxu1 }
 0x29b   :  { %v224_v63 = vadd.f32 %v223_v62, %v181_v61 }
 0x29c   :  { %v311_v0 = vpop.f32.mrf.mxu1 }
 0x29d   :  { %v229_v1 = vmax.f32 %v224_v63, 0.0 }
 0x29e   :  { %v226_v3 = vpop.f32.mrf.mxu1 }
 0x29f   :  { %v236_v4 = vmul.f32 %v234_v2, %v229_v1 }
 0x2a0   :  { %v312_v5 = vpop.f32.mrf.mxu1 }
 0x2a1   :  { %v237_v6 = vrot.slane %v236_v4, 4 }
 0x2a3   :  { %v238_v7 = vadd.f32 %v237_v6, %v236_v4 }
 0x2a5   :  { %v239_v8 = vrot.slane %v238_v7, 2 }
 0x2a7   :  { %v240_v9 = vadd.f32 %v239_v8, %v238_v7 }
 0x2a9   :  { %v241_v10 = vrot.slane %v240_v9, 1 }
 0x2ab   :  { %v242_v11 = vadd.f32 %v241_v10, %v240_v9 }
 0x2ad   :  { %v248_v13 = vadd.f32 %v246_v12, %v242_v11 }
 0x2af   :  { %v249_v14 = vmin.f32 %v248_v13, 100.0 }
 0x2b1   :  { %250 = vst [vmem:[#allocation2] sm:$0x1] %v249_v14 }
 0x2b2   :  { %330 = shalt.err (!%p327_p4)
}
 0x2b3   :  { %260 = dma.vmem_to_hbm [thread:$0]  %s258_s1, 16, %s472_s3, [#allocation3]  }
 0x2b4   :  { %339 = dma.done.wait [#allocation3], 16  }
 0x2b5   :  { %340 = vsyncadd [#allocation3], 4294967280 }
 0x2b6   :  { %264 = vsyncpa [#allocation3], 1 }

</bundles_post_ra>
